<compile_context>
chip_gen: v6e
topology: v6e:2x2x1
jax: 0.10.0
libtpu: 0.0.40
codegen_flags: <defaults>
</compile_context>

<pallas_src>
import jax
import jax.numpy as jnp
from jax.experimental import pallas as pl
from jax.experimental.pallas import tpu as pltpu

IGNORE_INDEX = -100


def _ce_loss_kernel(logits_ref, labels_ref, loss_ref):
    """loss[0, 0, p] = logsumexp(x[0, :, p]) - x[0, y[p], p]; 0 if label == ignore_index."""
    x = logits_ref[...].astype(jnp.float32)        # (1, C, TP)  pixels lane-dense
    lbl = labels_ref[...]                          # (1, 1, TP)  int32

    # numerically-stable log-softmax over the class (sublane) axis
    m = jnp.max(x, axis=1, keepdims=True)                                   # (1, 1, TP)
    lse = jnp.log(jnp.sum(jnp.exp(x - m), axis=1, keepdims=True)) + m       # (1, 1, TP)

    # gather x[0, y, p] via a tiny class iota (1, C, 1) broadcast against the labels
    # (no full block-sized int32 iota, no where-copy)
    cls = jax.lax.broadcasted_iota(jnp.int32, (1, x.shape[1], 1), 1)        # (1, C, 1)
    onehot = (cls == lbl).astype(jnp.float32)                               # (1, C, TP)
    x_at_y = jnp.sum(x * onehot, axis=1, keepdims=True)                     # (1, 1, TP)

    loss = lse - x_at_y
    # TODO(synk): out-of-range labels (e.g. 255) silently yield loss = logsumexp like
    # before; torch.nn.NLLLoss would raise.  Only ignore_index (-100) is masked here.
    loss_ref[...] = jnp.where(lbl == IGNORE_INDEX, 0.0, loss)


def _choose_tile_hw(C, HW, itemsize):
    """Pixel-axis tile (multiple of 128 lanes).

    Budgets the f32, sublane-padded working block (the kernel materializes a few
    block-sized f32 temporaries: upcast, exp, one-hot product), keeps >= ~8 pixel
    tiles when HW allows (v7x megacore / pipelining), and balances the tile sizes so
    the last (overhanging) tile is not mostly padding.
    """
    hw128 = pl.cdiv(HW, 128) * 128
    c_pad_f32 = pl.cdiv(C, 8) * 8                 # f32 sublane padding of the class dim
    # ~2 MiB per f32 working block -> a few block-sized temps + double-buffered native
    # input stay around 10-15 MiB total, safe on all generations (incl. v7x's 64 MiB VMEM).
    f32_block_budget = 2 * 1024 * 1024
    t = (f32_block_budget // max(1, c_pad_f32 * 4)) // 128 * 128
    t = max(128, min(t, hw128))
    # keep at least ~8 pixel tiles when the image is large enough
    t = min(t, max(128, (hw128 // (8 * 128)) * 128))
    # balance tiles so the last one isn't mostly overhang
    num_tiles = pl.cdiv(hw128, t)
    t = pl.cdiv(hw128 // 128, num_tiles) * 128
    return t
    # TODO(synk): for extremely large C (>> 10k classes) the minimum 128-pixel block can
    # still exceed VMEM; that case needs a C-reduction grid axis with an online
    # (flash-softmax style) max/sum carried in scratch.


def _vmem_limit_bytes():
    """Generation-aware scoped VMEM limit with a safe fallback."""
    try:
        cap = pltpu.get_tpu_info().vmem_capacity_bytes
    except Exception:
        cap = 64 * 1024 * 1024
    # half the physical capacity, clamped to [32 MiB, 96 MiB]
    return max(32 * 1024 * 1024, min(cap // 2, 96 * 1024 * 1024))


def per_pixel_cross_entropy(logits, labels):
    """logits: (N, C, HW) float; labels: (N, 1, HW) int32 -> (N, 1, HW) f32 per-pixel NLL."""
    N, C, HW = logits.shape
    itemsize = jnp.dtype(logits.dtype).itemsize
    tile_hw = _choose_tile_hw(C, HW, itemsize)
    num_tiles = pl.cdiv(HW, tile_hw)

    # No HBM padding pass: the last tile may overhang HW; Pallas pads the boundary
    # read (garbage lanes stay per-pixel local) and masks the boundary write.
    return pl.pallas_call(
        _ce_loss_kernel,
        out_shape=jax.ShapeDtypeStruct((N, 1, HW), jnp.float32),
        grid_spec=pltpu.PrefetchScalarGridSpec(
            num_scalar_prefetch=0,
            grid=(N, num_tiles),
            in_specs=[
                pl.BlockSpec((1, C, tile_hw), lambda n, s: (n, 0, s)),  # NCHW view, no transpose
                pl.BlockSpec((1, 1, tile_hw), lambda n, s: (n, 0, s)),
            ],
            out_specs=pl.BlockSpec((1, 1, tile_hw), lambda n, s: (n, 0, s)),
        ),
        compiler_params=pltpu.CompilerParams(
            dimension_semantics=("parallel", "parallel"),
            vmem_limit_bytes=_vmem_limit_bytes(),
        ),
    )(logits, labels)


def topk_cross_entropy(y, y_hat, extra_args, *, top_k=0.5):
    """Mirrors TopkCrossEntropy.forward (weight=None, ignore_index=-100, inner reduction='none')."""
    assert y_hat.ndim == 4, "expected NCHW logits"
    N, C, H, W = y_hat.shape
    # No NCHW->NHWC transpose and no f32 upcast in HBM: the kernel reads the native
    # [N, C, H*W] view (bf16 logits are fine and halve HBM traffic) and casts after DMA.
    logits = y_hat.reshape(N, C, H * W)
    labels = y.astype(jnp.int32).reshape(N, 1, H * W)

    # ---- hot path: per-pixel CE in Pallas ----
    loss = per_pixel_cross_entropy(logits, labels).reshape(-1)      # (P,) in (n, h*W+w) order

    if top_k == 1:
        return jnp.mean(loss)

    P = loss.shape[0]
    k = int(top_k * P)
    # TODO(synk): exact lax.top_k over all pixels can dominate wall time at very large P;
    # jax.lax.approx_max_k / a threshold-histogram scheme would be faster but changes
    # tie handling vs torch.topk, so the exact version is kept for semantic parity.
    top_vals, top_idxs = jax.lax.top_k(loss, k)

    b = extra_args.get('b', None)
    if b is None:
        return jnp.mean(top_vals)

    b_flat = b.reshape(-1)
    # idx is excluded iff b_flat[idx] != 0, and only if b.sum() > 0 (matches torch code path;
    # if every top-k index is excluded the mean of an empty set is NaN, same as torch).
    keep = jnp.where(jnp.sum(b_flat) > 0, b_flat[top_idxs] == 0, True)
    keep_f = keep.astype(jnp.float32)
    return jnp.sum(top_vals * keep_f) / jnp.sum(keep_f)


# ---------------- reference (pure JAX) for a correctness check ----------------
def _reference(y, y_hat, extra_args, top_k=0.5):
    logp = jax.nn.log_softmax(y_hat.astype(jnp.float32), axis=1)               # NCHW
    nll = -jnp.take_along_axis(logp, y.astype(jnp.int32)[:, None], axis=1)[:, 0]
    nll = jnp.where(y == IGNORE_INDEX, 0.0, nll)
    loss = nll.reshape(-1)
    if top_k == 1:
        return jnp.mean(loss)
    k = int(top_k * loss.shape[0])
    vals, idxs = jax.lax.top_k(loss, k)
    b = extra_args.get('b', None)
    if b is None:
        return jnp.mean(vals)
    b_flat = b.reshape(-1)
    keep = jnp.where(jnp.sum(b_flat) > 0, b_flat[idxs] == 0, True).astype(jnp.float32)
    return jnp.sum(vals * keep) / jnp.sum(keep)


if __name__ == "__main__":
    key = jax.random.PRNGKey(0)
    k1, k2, k3 = jax.random.split(key, 3)

    N, C, H, W = 2, 4, 16, 16                       # P = N*H*W = 512 pixels
    y_hat = jax.random.normal(k1, (N, C, H, W), dtype=jnp.float32)
    y = jax.random.randint(k2, (N, H, W), 0, C, dtype=jnp.int32)
    # exclusion mask 'b' (same spatial layout as labels), ~10% nonzero
    b = (jax.random.uniform(k3, (N, H, W)) < 0.1).astype(jnp.float32)

    extra_args = {'b': b}

    out = topk_cross_entropy(y, y_hat, extra_args, top_k=0.5)
    out = jax.block_until_ready(out)

    ref = jax.block_until_ready(_reference(y, y_hat, extra_args, top_k=0.5))
    assert jnp.allclose(out, ref, rtol=1e-5, atol=1e-5), (out, ref)

    print("KERNEL_OK")
</pallas_src>

<mosaic_0001>
module attributes {stable_mosaic.version = 11 : i64} {
  func.func @_ce_loss_kernel(%arg0: i32, %arg1: i32, %arg2: memref<1x4x128xf32, #tpu.memory_space<vmem>>, %arg3: memref<1x1x128xi32, #tpu.memory_space<vmem>>, %arg4: memref<1x1x128xf32, #tpu.memory_space<vmem>>) attributes {dimension_semantics = [#tpu.dimension_semantics<parallel>, #tpu.dimension_semantics<parallel>], iteration_bounds = array<i64: 2, 2>, scalar_prefetch = 0 : i64, scratch_operands = 0 : i64, tpu.core_type = #tpu.core_type<tc>, window_params = [{transform_indices = @transform_0, window_bounds = array<i64: 1, 4, 128>}, {transform_indices = @transform_1, window_bounds = array<i64: 1, 1, 128>}, {transform_indices = @transform_2, window_bounds = array<i64: 1, 1, 128>}]} {
    %c0 = arith.constant 0 : index
    %c0_0 = arith.constant 0 : index
    %c0_1 = arith.constant 0 : index
    %0 = vector.load %arg2[%c0, %c0_0, %c0_1] : memref<1x4x128xf32, #tpu.memory_space<vmem>>, vector<1x4x128xf32>
    %c0_2 = arith.constant 0 : index
    %c0_3 = arith.constant 0 : index
    %c0_4 = arith.constant 0 : index
    %1 = vector.load %arg3[%c0_2, %c0_3, %c0_4] : memref<1x1x128xi32, #tpu.memory_space<vmem>>, vector<1x1x128xi32>
    %cst = arith.constant dense<0xFF800000> : vector<1x128xf32>
    %2 = vector.multi_reduction <maximumf>, %0, %cst [1] : vector<1x4x128xf32> to vector<1x128xf32>
    %3 = vector.shape_cast %2 : vector<1x128xf32> to vector<1x1x128xf32>
    %4 = vector.broadcast %3 : vector<1x1x128xf32> to vector<1x4x128xf32>
    %5 = arith.subf %0, %4 : vector<1x4x128xf32>
    %6 = math.exp %5 : vector<1x4x128xf32>
    %cst_5 = arith.constant dense<0.000000e+00> : vector<1x128xf32>
    %7 = vector.multi_reduction <add>, %6, %cst_5 [1] : vector<1x4x128xf32> to vector<1x128xf32>
    %8 = vector.shape_cast %7 : vector<1x128xf32> to vector<1x1x128xf32>
    %9 = math.log %8 : vector<1x1x128xf32>
    %10 = arith.addf %9, %3 : vector<1x1x128xf32>
    %11 = tpu.iota {dimensions = array<i32: 1>} : vector<1x4x1xi32>
    %12 = vector.broadcast %11 : vector<1x4x1xi32> to vector<1x4x128xi32>
    %13 = vector.broadcast %1 : vector<1x1x128xi32> to vector<1x4x128xi32>
    %14 = arith.cmpi eq, %12, %13 : vector<1x4x128xi32>
    %15 = arith.extui %14 : vector<1x4x128xi1> to vector<1x4x128xi32>
    %16 = arith.sitofp %15 : vector<1x4x128xi32> to vector<1x4x128xf32>
    %17 = arith.mulf %0, %16 : vector<1x4x128xf32>
    %cst_6 = arith.constant dense<0.000000e+00> : vector<1x128xf32>
    %18 = vector.multi_reduction <add>, %17, %cst_6 [1] : vector<1x4x128xf32> to vector<1x128xf32>
    %19 = vector.shape_cast %18 : vector<1x128xf32> to vector<1x1x128xf32>
    %20 = arith.subf %10, %19 : vector<1x1x128xf32>
    %c-100_i32 = arith.constant -100 : i32
    %21 = vector.broadcast %c-100_i32 : i32 to vector<1x1x128xi32>
    %22 = arith.cmpi eq, %1, %21 : vector<1x1x128xi32>
    %cst_7 = arith.constant 0.000000e+00 : f32
    %23 = vector.broadcast %cst_7 : f32 to vector<1x1x128xf32>
    %24 = arith.select %22, %23, %20 : vector<1x1x128xi1>, vector<1x1x128xf32>
    %c0_8 = arith.constant 0 : index
    %c0_9 = arith.constant 0 : index
    %c0_10 = arith.constant 0 : index
    %25 = vector.load %arg4[%c0_8, %c0_9, %c0_10] : memref<1x1x128xf32, #tpu.memory_space<vmem>>, vector<1x1x128xf32>
    tpu.vector_store %arg4[%c0_8, %c0_9, %c0_10], %24 {strides = array<i32>} : memref<1x1x128xf32, #tpu.memory_space<vmem>>, vector<1x1x128xf32>,
    return
  }
  func.func @transform_0(%arg0: i32, %arg1: i32) -> (i32, i32, i32) {
    %c0_i32 = arith.constant 0 : i32
    %c0_i32_0 = arith.constant 0 : i32
    return %arg0, %c0_i32, %arg1 : i32, i32, i32
  }
  func.func @transform_1(%arg0: i32, %arg1: i32) -> (i32, i32, i32) {
    %c0_i32 = arith.constant 0 : i32
    %c0_i32_0 = arith.constant 0 : i32
    return %arg0, %c0_i32, %arg1 : i32, i32, i32
  }
  func.func @transform_2(%arg0: i32, %arg1: i32) -> (i32, i32, i32) {
    %c0_i32 = arith.constant 0 : i32
    %c0_i32_0 = arith.constant 0 : i32
    return %arg0, %c0_i32, %arg1 : i32, i32, i32
  }
}

</mosaic_0001>

<bundles_post_ra>
// kernel: tpu_custom_call.1
= control target key start
LH: loop header
LB: loop body
LE: loop exit
PB: predicated region body
PF: predicated region fallthrough
CT: control target
= control target key end

     0   :  { %s856_s0 = inlined_call_operand.hbm [shape: f32[2,4,256], index: 0, kind: input, shape index: {}]   ;;  %s857_s1 = inlined_call_operand.hbm [shape: s32[2,1,256], index: 1, kind: input, shape index: {}]   ;;  %s858_s2 = inlined_call_operand.hbm [shape: f32[2,1,256], index: 2, kind: output, shape index: {}]  }
   0x1   :  { %859 = sst [smem:[#allocation11_spill]] %s856_s0 }
   0x2   :  { %7 = vsyncpa [#allocation3], 0 }
   0x3   :  { %9 = vsyncpa [#allocation3 + $0x1], 0 }
   0x4   :  { %10 = vsyncpa [#allocation6], 0 }
   0x5   :  { %12 = vsyncpa [#allocation6 + $0x1], 0 }
   0x6   :  { %13 = vsyncpa [#allocation4], 0 }
   0x7   :  { %15 = vsyncpa [#allocation4 + $0x1], 0  ;;  %s657_s9 = smov 0   ;;  %s659_s10 = smov 0  }
   0x8   :  { %s661_s11 = smov 0   ;;  %s663_s12 = smov 0  }
   0x9   :  { %s665_s13 = smov 0   ;;  %s667_s14 = smov 0  }
   0xa   :  { %s669_s15 = smov 0   ;;  %s671_s16 = smov 0  }
   0xb LB: > { %s376_s17 = sadd.s32 4294967295, %s636_s16   ;;  %s377_s18 = sadd.s32 4294967294, %s636_s16   ;;  %s636_s16 = sphi %s671_s16, %s21_s16   ;;  %s632_s15 = sphi %s669_s15, %s873_s15   ;;  %s628_s14 = sphi %s667_s14, %s872_s14   ;;  %s624_s13 = sphi %s665_s13, %s871_s13   ;;  %s620_s12 = sphi %s663_s12, %s870_s12   ;;  %s616_s11 = sphi %s661_s11, %s869_s11   ;;  %s612_s10 = sphi %s659_s10, %s868_s10   ;;  %s608_s9 = sphi %s657_s9, %s867_s9  }
   0xc   : > { %s30_s19 = sadd.s32 1, %s628_s14  ;;  %s33_s20 = sadd.s32 1, %s632_s15 }
   0xd   : > { %p31_p0 = scmp.ge.s32.totalorder %s30_s19, 2  ;;  %s42_s21 = sadd.s32 1, %s616_s11 }
   0xe   : > { %p49_p1 = scmp.ne.s32.totalorder %s616_s11, %s612_s10  ;;  %p50_p2 = scmp.eq.s32.totalorder %s636_s16, 0 }
   0xf   : > { %s875_s19 = smov (%p31_p0, %s30_s19), 0  ;;  %s877_s20 = smov (!%p31_p0, %s33_s20), %s632_s15 }
  0x10   : > { %s38_s22 = ssub.s32 %s628_s14, %s875_s19  ;;  %p710_p3 = por %p50_p2, %p49_p1 }
  0x11   : > { %p35_p4 = scmp.ge.s32.totalorder %s877_s20, 2  ;;  %p55_p5 = scmp.ne.s32.totalorder %s612_s10, %s608_s9 }
  0x12   : > { %p56_p6 = scmp.eq.s32.totalorder %s376_s17, 0  ;;  %p109_p7 = scmp.eq.s32.totalorder %s376_s17, 3 }
  0x13   : > { %s879_s20 = smov (%p35_p4, %s877_s20), 0  ;;  %p115_p10 = scmp.eq.s32.totalorder %s377_s18, 3 }
  0x14   : > { %p718_p8 = por %p56_p6, %p55_p5  ;;  %p722_p9 = por %p109_p7, %p49_p1 }
  0x15   : > { %s37_s26 = ssub.s32 %s632_s15, %s879_s20  ;;  %p728_p12 = por %p115_p10, %p55_p5 }
  0x16   : > { %s39_s27 = sor.u32 %s38_s22, %s37_s26  ;;  %p409_p13 = scmp.lt.s32.totalorder %s636_s16, 4 }
  0x17   : > { %p40_p11 = scmp.eq.s32.totalorder %s39_s27, 0  ;;  %s734_s29 = sand.u32 1, %s616_s11  }
  0x18   : > { %s380_s3 = sshll.u32 %s734_s29, 2  ;;  %s381_s4 = sshll.u32 %s632_s15, 1 }
  0x19   : > { %s737_s30 = scalar_select %p40_p11, %s616_s11, %s42_s21  }
  0x1a   : > { %s742_s5 = sadd.s32 %s628_s14, %s381_s4  ;;  %s139_s6 = scalar_lea.vmem [#allocation2], %s380_s3 }
  0x1b   : > { %s148_s7 = sshll.u32 %s139_s6, 4  ;;  %s382_s8 = sshll.u32 %s742_s5, 6  ;;  %s149_s7 = int_to_ptr.vmem [resolvable:$true] %s148_s7 }
  0x1c   : > { %s864_s0 = sld [smem:[#allocation11_spill]]  ;;  %p750_p0 = pnand %p409_p13, %p710_p3 }
  0x1d   : > { %p385_p1 = scmp.ge.s32.totalorder %s636_s16, 1  ;;  %p172_p2 = scmp.lt.s32.totalorder %s636_s16, 5 }
  0x1e   : > { %s136_s21 = scalar_lea.sflag [#allocation3], %s734_s29  ;;  %p482_p4 = pneg %p750_p0 }
  0x1f   : > { %s493_s27 = scalar_lea.vmem %s149_s7, 64  ;;  %s638_s3 = smov [#allocation2]  }
  0x20   : > { %p494_p5 = scmp.ne.s32.totalorder %s149_s7, %s493_s27  ;;  %s498_s4 = sshll.u32 %s638_s3, 4  ;;  %s499_s4 = int_to_ptr.vmem [resolvable:$false] %s498_s4 }
  0x21   : > { %s500_s23 = scalar_lea.vmem %s499_s4, 128  ;;  %p501_p3 = scmp.lt.s32.totalorder %s149_s7, %s499_s4 }
  0x22   : > { %s146_s22 = scalar_lea.hbm %s864_s0, %s382_s8  ;;  %p496_p6 = pnand %p494_p5, %p482_p4 }
  0x23   : > { %p502_p10 = scmp.lt.s32.totalorder %s500_s23, %s493_s27 }
  0x24   : > { %p497_p7 = pneg %p496_p6 }
  0x25   : > { %p503_p11 = por %p502_p10, %p501_p3 }
  0x27   : > { %p504_p13 = pnand %p503_p11, %p497_p7 }
  0x29   : > { %507 = shalt.err (!%p504_p13)
}
  0x2a   : > { %401 = dma.hbm_to_vmem [thread:$0]  (!%p750_p0), %s146_s22, 64, %s149_s7, %s136_s21  }
  0x2b   : > { %p768_p5 = pnand %p385_p1, %p172_p2  ;;  %s384_s8 = sshll.u32 %s742_s5, 4 }
  0x2c   : > { %s158_s17 = scalar_lea.vmem [#allocation5], %s734_s29  ;;  %s165_s4 = scalar_lea.hbm %s857_s1, %s384_s8 }
  0x2d   : > { %s167_s18 = sshll.u32 %s158_s17, 4  ;;  %s156_s23 = scalar_lea.sflag [#allocation6], %s734_s29  ;;  %s168_s18 = int_to_ptr.vmem [resolvable:$true] %s167_s18 }
  0x2e   : > { %s521_s0 = scalar_lea.vmem %s168_s18, 16  ;;  %s639_s7 = smov [#allocation5]  }
  0x2f   : > { %p522_p6 = scmp.ne.s32.totalorder %s168_s18, %s521_s0  ;;  %s526_s22 = sshll.u32 %s639_s7, 4  ;;  %s527_s22 = int_to_ptr.vmem [resolvable:$false] %s526_s22 }
  0x30   : > { %s528_s21 = scalar_lea.vmem %s527_s22, 32  ;;  %p529_p1 = scmp.lt.s32.totalorder %s168_s18, %s527_s22 }
  0x31   : > { %p524_p7 = pnand %p522_p6, %p482_p4  ;;  %p530_p2 = scmp.lt.s32.totalorder %s528_s21, %s521_s0 }
  0x33   : > { %p525_p3 = pneg %p524_p7  ;;  %p531_p10 = por %p530_p2, %p529_p1 }
  0x35   : > { %p532_p11 = pnand %p531_p10, %p525_p3 }
  0x37   : > { %535 = shalt.err (!%p532_p11)
}
  0x38   : > { %404 = dma.hbm_to_vmem [thread:$0]  (!%p750_p0), %s165_s4, 16, %s168_s18, %s156_s23  }
  0x39   : > { %176 = sbr.rel (%p768_p5) target bundleno = 144 (0x90), region = 28  ;;  %s786_s29 = sand.u32 (!%p768_p5), 1, %s612_s10  }
  0x3a   : > { %s386_s5 = sshll.u32 (!%p768_p5), %s786_s29, 2  ;;  %s179_s8 = scalar_lea.sflag (!%p768_p5), [#allocation3], %s786_s29 }
  0x3b   : > { %s182_s17 = scalar_lea.vmem (!%p768_p5), [#allocation2], %s386_s5 }
  0x3e   : > { %595 = dma.done.wait (%p718_p8), %s179_s8, 64  }
  0x3f   : > { %597 = vsyncadd (%p718_p8), %s179_s8, 4294967232  ;;  %s188_s0 = scalar_lea.sflag [#allocation6], %s786_s29  ;;  %s190_s26 = scalar_lea.vmem [#allocation5], %s786_s29 }
  0x40   : > { %599 = dma.done.wait (%p718_p8), %s188_s0, 16  }
  0x41   : > { %601 = vsyncadd (%p718_p8), %s188_s0, 4294967280  ;;  %vm216_vm0 = vcmask 1043456   ;;  %v214_v0 = vld [vmem:[%s182_s17] sm:$0xf]  ;;  %v237_v7 = vlaneseq  ;;  %v640_v15 = vmov 0.0   ;;  %s388_s24 = sshll.u32 %s624_s13, 1 }
  0x42   : > { %v217_v1 = vsel %vm216_vm0, %v214_v0, -inf  ;;  %v215_v13 = vld [vmem:[%s190_s26] sm:$0x1]  ;;  %s269_s6 = sadd.s32 %s620_s12, %s388_s24  ;;  %s213_s18 = scalar_lea.vmem [#allocation7], %s786_s29 }
  0x43   : > { %v218_v2 = vrot.slane %v217_v1, 4  ;;  %v238_v10 = vshrl.u32 %v237_v7, 7  ;;  %s273_s27 = sshll.u32 %s213_s18, 4  ;;  %s389_s3 = sshll.u32 %s269_s6, 4  ;;  %vm255_vm2 = vcmp.eq.s32.totalorder %v215_v13, 4294967196  ;;  %s806_s27 = int_to_ptr.vmem [resolvable:$true] %s273_s27 }
  0x44   : > { %s271_s13 = scalar_lea.hbm %s858_s2, %s389_s3  ;;  %s259_s12 = scalar_lea.sflag [#allocation4], %s786_s29 }
  0x45   : > { %v219_v3 = vmax.f32 %v217_v1, %v218_v2  ;;  %v241_v12 = vsub.s32 0, %v238_v10  ;;  %s536_s7 = scalar_lea.vmem %s806_s27, 16  ;;  %s641_s22 = smov [#allocation7]  }
  0x46   : > { %p537_p8 = scmp.ne.s32.totalorder %s806_s27, %s536_s7  ;;  %s540_s21 = sshll.u32 %s641_s22, 4  ;;  %s541_s21 = int_to_ptr.vmem [resolvable:$false] %s540_s21 }
  0x47   : > { %v220_v4 = vrot.slane %v219_v3, 2  ;;  %v242_v14 = vrot.slane %v215_v13, %v241_v12  ;;  %s542_s5 = scalar_lea.vmem %s541_s21, 32  ;;  %p543_p13 = scmp.lt.s32.totalorder %s806_s27, %s541_s21 }
  0x48   : > { %p538_p0 = pnand %p537_p8, %p722_p9  ;;  %p544_p5 = scmp.lt.s32.totalorder %s542_s5, %s536_s7 }
  0x49   : > { %v221_v5 = vmax.f32 %v219_v3, %v220_v4  ;;  %vm243_vm1 = vcmp.eq.s32.totalorder %v238_v10, %v242_v14 }
  0x4a   : > { %v387_v16 = vsel %vm243_vm1, 1.0, %v640_v15  ;;  %p539_p4 = pneg %p538_p0  ;;  %p545_p6 = por %p544_p5, %p543_p13 }
  0x4b   : > { %v222_v6 = vrot.slane %v221_v5, 1  ;;  %v246_v19 = vmul.f32 %v387_v16, %v214_v0 }
  0x4c   : > { %p546_p7 = pnand %p545_p6, %p539_p4 }
  0x4d   : > { %v223_v8 = vmax.f32 %v221_v5, %v222_v6  ;;  %v247_v22 = vsel %vm216_vm0, %v246_v19, 0.0 }
  0x4e   : > { %v248_v25 = vrot.slane %v247_v22, 4 }
  0x4f   : > { %v224_v9 = vsub.f32 %v214_v0, %v223_v8 }
  0x50   : > { %v249_v28 = vadd.f32 %v248_v25, %v247_v22 }
  0x51   : > { %v225_v11 = vmul.f32 1.442695, %v224_v9 }
  0x52   : > { %v250_v29 = vrot.slane %v249_v28, 2 }
  0x53   : > { %476 = vpow2.f32 %v225_v11 }
  0x54   : > { %v251_v30 = vadd.f32 %v250_v29, %v249_v28 }
  0x56   : > { %v252_v31 = vrot.slane %v251_v30, 1 }
  0x58   : > { %v253_v34 = vadd.f32 %v252_v31, %v251_v30 }
  0x60   : > { %v477_v17 = vpop.eup %476 }
  0x61   : > { %v227_v18 = vsel %vm216_vm0, %v477_v17, 0.0 }
  0x62   : > { %v228_v20 = vrot.slane %v227_v18, 4 }
  0x64   : > { %v229_v21 = vadd.f32 %v228_v20, %v227_v18 }
  0x66   : > { %v230_v23 = vrot.slane %v229_v21, 2 }
  0x68   : > { %v231_v24 = vadd.f32 %v230_v23, %v229_v21 }
  0x6a   : > { %v232_v26 = vrot.slane %v231_v24, 1 }
  0x6c   : > { %v233_v27 = vadd.f32 %v232_v26, %v231_v24 }
  0x6e   : > { %478 = vlog2.f32 %v233_v27 }
  0x7b   : > { %v479_v32 = vpop.eup %478 }
  0x7c   : > { %v235_v33 = vmul.f32 0.6931472, %v479_v32 }
  0x7e   : > { %v236_v35 = vadd.f32 %v235_v33, %v223_v8 }
  0x80   : > { %v254_v36 = vsub.f32 %v236_v35, %v253_v34 }
  0x82   : > { %v256_v37 = vsel %vm255_vm2, 0.0, %v254_v36 }
  0x83   : > { %257 = vst [vmem:[%s213_s18] sm:$0x1] %v256_v37 }
  0x84   : > { %549 = shalt.err (!%p546_p7)
}
  0x85   : > { %s550_s8 = scalar_lea.hbm %s271_s13, 16  ;;  %s554_s0 = scalar_lea.hbm %s858_s2, 64 }
  0x86   : > { %p551_p3 = scmp.ne.s32.totalorder %s271_s13, %s550_s8  ;;  %p555_p10 = scmp.lt.s32.totalorder %s271_s13, %s858_s2 }
  0x87   : > { %p556_p11 = scmp.lt.s32.totalorder %s554_s0, %s550_s8 }
  0x88   : > { %p552_p1 = pnand %p551_p3, %p722_p9 }
  0x89   : > { %p557_p8 = por %p556_p11, %p555_p10 }
  0x8a   : > { %p553_p2 = pneg %p552_p1 }
  0x8c   : > { %p558_p0 = pnand %p557_p8, %p553_p2 }
  0x8e   : > { %561 = shalt.err (!%p558_p0)
}
  0x8f   : > { %396 = dma.vmem_to_hbm [thread:$0]  (%p722_p9), %s806_s27, 16, %s271_s13, %s259_s12  }
  0x90 PF: > { %p410_p4 = scmp.ge.s32.totalorder %s636_s16, 2  ;;  %s285_s6 = sand.u32 1, %s608_s9  }
  0x91   : > { %s286_s18 = scalar_lea.sflag [#allocation4], %s285_s6 }
  0x92   : > { %p406_p13 = pnand %p410_p4, %p728_p12 }
  0x94   : > { %p407_p5 = pneg %p406_p13 }
  0x96   : > { %603 = dma.done.wait (%p407_p5), %s286_s18, 16  }
  0x97   : > { %605 = vsyncadd (%p407_p5), %s286_s18, 4294967280  ;;  %s21_s16 = sadd.s32 1, %s636_s16   ;;  %s867_s9 = smov %s612_s10 }
  0x98   : > { %p18_p6 = scmp.ge.s32.totalorder %s21_s16, 6   ;;  %s868_s10 = smov %s616_s11 }
  0x99   : > { %s869_s11 = smov %s737_s30  ;;  %s870_s12 = smov %s628_s14 }
  0x9a   : > { %s871_s13 = smov %s632_s15  ;;  %s872_s14 = smov %s875_s19 }
  0x9b   : > { %s873_s15 = smov %s879_s20  ;;  %20 = sbr.rel (!%p18_p6) target bundleno = 11 (0xb), region = 86 }
  0xa0   :  { %290 = vsyncpa [#allocation3], 1 }
  0xa1   :  { %292 = vsyncpa [#allocation3 + $0x1], 1 }
  0xa2   :  { %293 = vsyncpa [#allocation6], 1 }
  0xa3   :  { %295 = vsyncpa [#allocation6 + $0x1], 1 }
  0xa4   :  { %296 = vsyncpa [#allocation4], 1 }
  0xa5   :  { %298 = vsyncpa [#allocation4 + $0x1], 1 }

</bundles_post_ra>
